<compile_context>
chip_gen: v6e
topology: v6e:2x2x1
jax: 0.10.0
libtpu: 0.0.40
codegen_flags: <defaults>
</compile_context>

<pallas_src>
import functools

import jax
import jax.numpy as jnp
from jax import lax
from jax.experimental import pallas as pl
from jax.experimental.pallas import tpu as pltpu


def _round_up(v, m):
    return (v + m - 1) // m * m


def _mlp_kernel(x_ref, w_in_ref, b_in_ref, w_h_ref, b_h_ref,
                w_out_ref, b_out_ref, o_ref, *, depth):
    """Fused MLP forward for one batch tile (feature-major layout).

    x_ref:     (input_dim, TB)        -- batch on the lane axis
    w_in_ref:  (hidden_dim, input_dim)
    b_in_ref:  (hidden_dim, 1)
    w_h_ref:   (n_h, hidden_dim, hidden_dim)   (n_h = max(depth, 1))
    b_h_ref:   (n_h, hidden_dim, 1)
    w_out_ref: (output_dim, hidden_dim)
    b_out_ref: (output_dim, 1)
    o_ref:     (output_dim, TB)
    """
    mxu_dtype = w_in_ref.dtype  # bf16 when use_bf16, else f32

    # input layer + tanh   (f32 accumulate, f32 bias/activation path: v5e-safe)
    z = jnp.dot(w_in_ref[...], x_ref[...].astype(mxu_dtype),
                preferred_element_type=jnp.float32)
    z = jnp.tanh(z + b_in_ref[...])

    def hidden_layer(d, z):
        h = jnp.dot(w_h_ref[d], z.astype(mxu_dtype),
                    preferred_element_type=jnp.float32)
        return jnp.tanh(h + b_h_ref[d])          # (hid,1) bias: direct broadcast

    if depth > 0:
        if depth <= 4:
            # short static unroll: no vreg-pressure concern at this depth
            for d in range(depth):
                z = hidden_layer(d, z)
        else:
            # bound live ranges for deep nets while keeping scheduler visibility
            z = lax.fori_loop(0, depth, hidden_layer, z, unroll=True)

    # output layer (no activation) -- lane-dense (output_dim, TB) store
    z = jnp.dot(w_out_ref[...], z.astype(mxu_dtype),
                preferred_element_type=jnp.float32)
    z = z + b_out_ref[...]
    o_ref[...] = z.astype(o_ref.dtype)


def vanilla_mlp_forward(x, params, *, depth, tile_batch=256, use_bf16=False):
    """Run the fused MLP Pallas kernel.

    x: (B, input_dim) float32 (any B; padded internally).
    params (PyTorch nn.Linear layout):
      w_in (hid,in), b_in (hid,1), w_h (depth,hid,hid), b_h (depth,hid,1),
      w_out (out,hid), b_out (out,1).
    """
    B, input_dim = x.shape
    hidden_dim = params["w_in"].shape[0]
    output_dim = params["w_out"].shape[0]

    # ---- choose a lane-dense batch tile (multiple of 128) ----
    tb = max(128, min(_round_up(tile_batch, 128), _round_up(B, 128)))
    Bp = _round_up(B, tb)
    # v7x has 2 TensorCores: prefer >=2 parallel grid steps when enough work.
    if Bp // tb < 2 and Bp >= 256:
        tb = _round_up(Bp // 2, 128)
        Bp = _round_up(B, tb)
    grid = (Bp // tb,)

    # ---- batch padding + feature-major transpose (done once in the wrapper) ----
    xp = x if Bp == B else jnp.pad(x, ((0, Bp - B), (0, 0)))
    x_t = xp.T  # (input_dim, Bp): batch on the 128-lane axis

    # ---- weight/bias residency (bf16 MXU operands optional; biases stay f32) ----
    w_dtype = jnp.bfloat16 if use_bf16 else x.dtype
    w_in = params["w_in"].astype(w_dtype)
    w_out = params["w_out"].astype(w_dtype)
    b_in = params["b_in"].astype(jnp.float32)
    b_out = params["b_out"].astype(jnp.float32)
    if depth > 0:
        w_h = params["w_h"].astype(w_dtype)
        b_h = params["b_h"].astype(jnp.float32)
    else:
        # depth == 0: a zero-sized block dim cannot lower; pass one dummy layer
        # that the kernel never reads (loop range is empty).
        w_h = jnp.zeros((1, hidden_dim, hidden_dim), w_dtype)
        b_h = jnp.zeros((1, hidden_dim, 1), jnp.float32)
    n_h = w_h.shape[0]

    # ---- explicit VMEM budget (weights double-buffered by the pipeline + tiles) ----
    def _nbytes(a):
        return int(a.size) * a.dtype.itemsize
    weight_bytes = sum(_nbytes(a) for a in (w_in, b_in, w_h, b_h, w_out, b_out))
    act_bytes = 4 * tb * (input_dim + output_dim + 4 * hidden_dim)
    vmem_limit = int(min(64 << 20,                      # v7x physical ceiling
                         max(16 << 20, 2 * weight_bytes + 2 * act_bytes + (4 << 20))))

    kernel = functools.partial(_mlp_kernel, depth=depth)

    out_t = pl.pallas_call(
        kernel,
        out_shape=jax.ShapeDtypeStruct((output_dim, Bp), x.dtype),
        grid_spec=pltpu.PrefetchScalarGridSpec(
            num_scalar_prefetch=0,
            grid=grid,
            in_specs=[
                # batch tile of the (transposed) input: lanes = batch
                pl.BlockSpec((input_dim, tb), lambda i: (0, i)),
                # all weights/biases: full arrays, resident in VMEM
                pl.BlockSpec((hidden_dim, input_dim), lambda i: (0, 0)),
                pl.BlockSpec((hidden_dim, 1), lambda i: (0, 0)),
                pl.BlockSpec((n_h, hidden_dim, hidden_dim), lambda i: (0, 0, 0)),
                pl.BlockSpec((n_h, hidden_dim, 1), lambda i: (0, 0, 0)),
                pl.BlockSpec((output_dim, hidden_dim), lambda i: (0, 0)),
                pl.BlockSpec((output_dim, 1), lambda i: (0, 0)),
            ],
            out_specs=pl.BlockSpec((output_dim, tb), lambda i: (0, i)),
        ),
        compiler_params=pltpu.CompilerParams(
            dimension_semantics=("parallel",),
            vmem_limit_bytes=vmem_limit),
    )(x_t, w_in, b_in, w_h, b_h, w_out, b_out)

    out = out_t.T  # (Bp, output_dim), back to batch-major
    return out[:B] if Bp != B else out


def init_params(key, input_dim, hidden_dim, output_dim, depth):
    """Deterministic synthetic init, PyTorch nn.Linear layout: W (out,in), b (out,1)."""
    ks = jax.random.split(key, 3)

    def lin(k, fan_in, fan_out):
        bound = 1.0 / jnp.sqrt(jnp.float32(fan_in))
        kw, kb = jax.random.split(k)
        w = jax.random.uniform(kw, (fan_out, fan_in), jnp.float32, -bound, bound)
        b = jax.random.uniform(kb, (fan_out, 1), jnp.float32, -bound, bound)
        return w, b

    w_in, b_in = lin(ks[0], input_dim, hidden_dim)

    if depth > 0:
        hkeys = jax.random.split(ks[1], depth)
        whs, bhs = [], []
        for d in range(depth):
            w, b = lin(hkeys[d], hidden_dim, hidden_dim)
            whs.append(w)
            bhs.append(b)
        w_h = jnp.stack(whs, axis=0)   # (depth, hid, hid)
        b_h = jnp.stack(bhs, axis=0)   # (depth, hid, 1)
    else:
        w_h = jnp.zeros((0, hidden_dim, hidden_dim), jnp.float32)
        b_h = jnp.zeros((0, hidden_dim, 1), jnp.float32)

    w_out, b_out = lin(ks[2], hidden_dim, output_dim)

    return {"w_in": w_in, "b_in": b_in, "w_h": w_h, "b_h": b_h,
            "w_out": w_out, "b_out": b_out}


def reference_forward(x, params, depth):
    """Pure-JAX reference matching PyTorch: z @ W.T + b per layer."""
    z = jnp.tanh(x @ params["w_in"].T + params["b_in"][:, 0])
    for d in range(depth):
        z = jnp.tanh(z @ params["w_h"][d].T + params["b_h"][d, :, 0])
    return z @ params["w_out"].T + params["b_out"][:, 0]


if __name__ == "__main__":
    # PDE-style MLP: low-dimensional coords -> low-dimensional output.
    input_dim, hidden_dim, output_dim, depth = 4, 32, 4, 2

    key = jax.random.PRNGKey(0)
    kx, kp = jax.random.split(key)
    params = init_params(kp, input_dim, hidden_dim, output_dim, depth)

    # 1) ragged small batch like VanillaMLP.test_forward (20 points): exercises
    #    batch padding + single lane-dense tile.
    x1 = jax.random.normal(kx, (20, input_dim), jnp.float32)
    out1 = jax.block_until_ready(vanilla_mlp_forward(x1, params, depth=depth))
    ref1 = reference_forward(x1, params, depth)
    assert out1.shape == (20, output_dim)
    assert jnp.allclose(out1, ref1, atol=1e-5, rtol=1e-5), "mismatch (f32, ragged)"

    # 2) larger batch -> 2 parallel grid steps (both TensorCores on v7x), f32.
    x2 = jax.random.normal(jax.random.PRNGKey(1), (384, input_dim), jnp.float32)
    out2 = jax.block_until_ready(vanilla_mlp_forward(x2, params, depth=depth))
    ref2 = reference_forward(x2, params, depth)
    assert out2.shape == (384, output_dim)
    assert jnp.allclose(out2, ref2, atol=1e-5, rtol=1e-5), "mismatch (f32, tiled)"

    # 3) bf16 MXU operands (f32 accumulate) -- looser tolerance.
    out3 = jax.block_until_ready(
        vanilla_mlp_forward(x2, params, depth=depth, use_bf16=True))
    assert jnp.allclose(out3, ref2, atol=5e-2, rtol=5e-2), "mismatch (bf16)"

    print("KERNEL_OK")
</pallas_src>

<mosaic_0001>
module attributes {stable_mosaic.version = 11 : i64} {
  func.func @_mlp_kernel(%arg0: i32, %arg1: memref<4x128xf32, #tpu.memory_space<vmem>>, %arg2: memref<32x4xf32, #tpu.memory_space<vmem>>, %arg3: memref<32x1xf32, #tpu.memory_space<vmem>>, %arg4: memref<2x32x32xf32, #tpu.memory_space<vmem>>, %arg5: memref<2x32x1xf32, #tpu.memory_space<vmem>>, %arg6: memref<4x32xf32, #tpu.memory_space<vmem>>, %arg7: memref<4x1xf32, #tpu.memory_space<vmem>>, %arg8: memref<4x128xf32, #tpu.memory_space<vmem>>) attributes {dimension_semantics = [#tpu.dimension_semantics<parallel>], iteration_bounds = array<i64: 1>, scalar_prefetch = 0 : i64, scratch_operands = 0 : i64, tpu.core_type = #tpu.core_type<tc>, window_params = [{transform_indices = @transform_0, window_bounds = array<i64: 4, 128>}, {pipeline_mode = #tpu.pipeline_mode<synchronous>, transform_indices = @transform_1, window_bounds = array<i64: 32, 4>}, {pipeline_mode = #tpu.pipeline_mode<synchronous>, transform_indices = @transform_2, window_bounds = array<i64: 32, 1>}, {pipeline_mode = #tpu.pipeline_mode<synchronous>, transform_indices = @transform_3, window_bounds = array<i64: 2, 32, 32>}, {pipeline_mode = #tpu.pipeline_mode<synchronous>, transform_indices = @transform_4, window_bounds = array<i64: 2, 32, 1>}, {pipeline_mode = #tpu.pipeline_mode<synchronous>, transform_indices = @transform_5, window_bounds = array<i64: 4, 32>}, {pipeline_mode = #tpu.pipeline_mode<synchronous>, transform_indices = @transform_6, window_bounds = array<i64: 4, 1>}, {transform_indices = @transform_7, window_bounds = array<i64: 4, 128>}]} {
    %c0 = arith.constant 0 : index
    %c0_0 = arith.constant 0 : index
    %0 = vector.load %arg2[%c0, %c0_0] : memref<32x4xf32, #tpu.memory_space<vmem>>, vector<32x4xf32>
    %c0_1 = arith.constant 0 : index
    %c0_2 = arith.constant 0 : index
    %1 = vector.load %arg1[%c0_1, %c0_2] : memref<4x128xf32, #tpu.memory_space<vmem>>, vector<4x128xf32>
    %cst = arith.constant dense<0.000000e+00> : vector<32x128xf32>
    %2 = tpu.matmul %0, %1, %cst {dimension_numbers = #tpu.dot_dimension_numbers<[1], [0], [0], [1], [0, 0, 1, 1], [], []>} : vector<32x4xf32>, vector<4x128xf32>, vector<32x128xf32> -> vector<32x128xf32>
    %c0_3 = arith.constant 0 : index
    %c0_4 = arith.constant 0 : index
    %3 = vector.load %arg3[%c0_3, %c0_4] : memref<32x1xf32, #tpu.memory_space<vmem>>, vector<32x1xf32>
    %4 = vector.broadcast %3 : vector<32x1xf32> to vector<32x128xf32>
    %5 = arith.addf %2, %4 : vector<32x128xf32>
    %6 = math.tanh %5 : vector<32x128xf32>
    %c0_5 = arith.constant 0 : index
    %c0_6 = arith.constant 0 : index
    %c0_7 = arith.constant 0 : index
    %7 = vector.load %arg4[%c0_5, %c0_6, %c0_7] : memref<2x32x32xf32, #tpu.memory_space<vmem>>, vector<1x32x32xf32>
    %8 = vector.shape_cast %7 : vector<1x32x32xf32> to vector<32x32xf32>
    %cst_8 = arith.constant dense<0.000000e+00> : vector<32x128xf32>
    %9 = tpu.matmul %8, %6, %cst_8 {dimension_numbers = #tpu.dot_dimension_numbers<[1], [0], [0], [1], [0, 0, 1, 1], [], []>} : vector<32x32xf32>, vector<32x128xf32>, vector<32x128xf32> -> vector<32x128xf32>
    %c0_9 = arith.constant 0 : index
    %c0_10 = arith.constant 0 : index
    %c0_11 = arith.constant 0 : index
    %10 = vector.load %arg5[%c0_9, %c0_10, %c0_11] : memref<2x32x1xf32, #tpu.memory_space<vmem>>, vector<1x32x1xf32>
    %11 = vector.shape_cast %10 : vector<1x32x1xf32> to vector<32x1xf32>
    %12 = vector.broadcast %11 : vector<32x1xf32> to vector<32x128xf32>
    %13 = arith.addf %9, %12 : vector<32x128xf32>
    %14 = math.tanh %13 : vector<32x128xf32>
    %c1 = arith.constant 1 : index
    %c0_12 = arith.constant 0 : index
    %c0_13 = arith.constant 0 : index
    %15 = vector.load %arg4[%c1, %c0_12, %c0_13] : memref<2x32x32xf32, #tpu.memory_space<vmem>>, vector<1x32x32xf32>
    %16 = vector.shape_cast %15 : vector<1x32x32xf32> to vector<32x32xf32>
    %cst_14 = arith.constant dense<0.000000e+00> : vector<32x128xf32>
    %17 = tpu.matmul %16, %14, %cst_14 {dimension_numbers = #tpu.dot_dimension_numbers<[1], [0], [0], [1], [0, 0, 1, 1], [], []>} : vector<32x32xf32>, vector<32x128xf32>, vector<32x128xf32> -> vector<32x128xf32>
    %c1_15 = arith.constant 1 : index
    %c0_16 = arith.constant 0 : index
    %c0_17 = arith.constant 0 : index
    %18 = vector.load %arg5[%c1_15, %c0_16, %c0_17] : memref<2x32x1xf32, #tpu.memory_space<vmem>>, vector<1x32x1xf32>
    %19 = vector.shape_cast %18 : vector<1x32x1xf32> to vector<32x1xf32>
    %20 = vector.broadcast %19 : vector<32x1xf32> to vector<32x128xf32>
    %21 = arith.addf %17, %20 : vector<32x128xf32>
    %22 = math.tanh %21 : vector<32x128xf32>
    %c0_18 = arith.constant 0 : index
    %c0_19 = arith.constant 0 : index
    %23 = vector.load %arg6[%c0_18, %c0_19] : memref<4x32xf32, #tpu.memory_space<vmem>>, vector<4x32xf32>
    %cst_20 = arith.constant dense<0.000000e+00> : vector<4x128xf32>
    %24 = tpu.matmul %23, %22, %cst_20 {dimension_numbers = #tpu.dot_dimension_numbers<[1], [0], [0], [1], [0, 0, 1, 1], [], []>} : vector<4x32xf32>, vector<32x128xf32>, vector<4x128xf32> -> vector<4x128xf32>
    %c0_21 = arith.constant 0 : index
    %c0_22 = arith.constant 0 : index
    %25 = vector.load %arg7[%c0_21, %c0_22] : memref<4x1xf32, #tpu.memory_space<vmem>>, vector<4x1xf32>
    %26 = vector.broadcast %25 : vector<4x1xf32> to vector<4x128xf32>
    %27 = arith.addf %24, %26 : vector<4x128xf32>
    %c0_23 = arith.constant 0 : index
    %c0_24 = arith.constant 0 : index
    %28 = vector.load %arg8[%c0_23, %c0_24] : memref<4x128xf32, #tpu.memory_space<vmem>>, vector<4x128xf32>
    tpu.vector_store %arg8[%c0_23, %c0_24], %27 {strides = array<i32>} : memref<4x128xf32, #tpu.memory_space<vmem>>, vector<4x128xf32>,
    return
  }
  func.func @transform_0(%arg0: i32) -> (i32, i32) {
    %c0_i32 = arith.constant 0 : i32
    %c0_i32_0 = arith.constant 0 : i32
    return %c0_i32, %arg0 : i32, i32
  }
  func.func @transform_1(%arg0: i32) -> (i32, i32) {
    %c0_i32 = arith.constant 0 : i32
    %c0_i32_0 = arith.constant 0 : i32
    %c0_i32_1 = arith.constant 0 : i32
    return %c0_i32, %c0_i32_0 : i32, i32
  }
  func.func @transform_2(%arg0: i32) -> (i32, i32) {
    %c0_i32 = arith.constant 0 : i32
    %c0_i32_0 = arith.constant 0 : i32
    %c0_i32_1 = arith.constant 0 : i32
    return %c0_i32, %c0_i32_0 : i32, i32
  }
  func.func @transform_3(%arg0: i32) -> (i32, i32, i32) {
    %c0_i32 = arith.constant 0 : i32
    %c0_i32_0 = arith.constant 0 : i32
    %c0_i32_1 = arith.constant 0 : i32
    %c0_i32_2 = arith.constant 0 : i32
    return %c0_i32, %c0_i32_0, %c0_i32_1 : i32, i32, i32
  }
  func.func @transform_4(%arg0: i32) -> (i32, i32, i32) {
    %c0_i32 = arith.constant 0 : i32
    %c0_i32_0 = arith.constant 0 : i32
    %c0_i32_1 = arith.constant 0 : i32
    %c0_i32_2 = arith.constant 0 : i32
    return %c0_i32, %c0_i32_0, %c0_i32_1 : i32, i32, i32
  }
  func.func @transform_5(%arg0: i32) -> (i32, i32) {
    %c0_i32 = arith.constant 0 : i32
    %c0_i32_0 = arith.constant 0 : i32
    %c0_i32_1 = arith.constant 0 : i32
    return %c0_i32, %c0_i32_0 : i32, i32
  }
  func.func @transform_6(%arg0: i32) -> (i32, i32) {
    %c0_i32 = arith.constant 0 : i32
    %c0_i32_0 = arith.constant 0 : i32
    %c0_i32_1 = arith.constant 0 : i32
    return %c0_i32, %c0_i32_0 : i32, i32
  }
  func.func @transform_7(%arg0: i32) -> (i32, i32) {
    %c0_i32 = arith.constant 0 : i32
    %c0_i32_0 = arith.constant 0 : i32
    return %c0_i32, %arg0 : i32, i32
  }
}

</mosaic_0001>

<bundles_post_ra>
// kernel: tpu_custom_call.1
= control target key start
LH: loop header
LB: loop body
LE: loop exit
PB: predicated region body
PF: predicated region fallthrough
CT: control target
= control target key end

     0   :  { %vm69_vm0 = vcmask 1043456   ;;  %vm56_vm1 = vcmask 31744   ;;  %v665_v5 = vmov 0   ;;  %s806_s0 = inlined_call_operand.vmem [shape: f32[4,128], index: 0, kind: input, shape index: {}]   ;;  %s807_s1 = inlined_call_operand.vmem [shape: f32[32,4], index: 1, kind: input, shape index: {}]   ;;  %s808_s2 = inlined_call_operand.vmem [shape: f32[32,1], index: 2, kind: input, shape index: {}]   ;;  %s809_s3 = inlined_call_operand.vmem [shape: f32[2,32,32], index: 3, kind: input, shape index: {}]   ;;  %s810_s4 = inlined_call_operand.vmem [shape: f32[2,32,1], index: 4, kind: input, shape index: {}]   ;;  %s811_s5 = inlined_call_operand.vmem [shape: f32[4,32], index: 5, kind: input, shape index: {}]   ;;  %s812_s6 = inlined_call_operand.vmem [shape: f32[4,1], index: 6, kind: input, shape index: {}]   ;;  %s813_s7 = inlined_call_operand.hbm [shape: f32[4,128], index: 7, kind: output, shape index: {}]  }
   0x1   :  { %v31_v0 = vld [vmem:[%s806_s0] sm:$0xf]  ;;  %v28_v2 = vld [vmem:[%s807_s1 + $0x8] sm:$0xff]  ;;  %v29_v3 = vld [vmem:[%s807_s1 + $0x10] sm:$0xff]  ;;  %617 = vset.pattern.permute.xlu0 %v665_v5  ;;  %618 = vset.pattern.permute.xlu1 %v665_v5 }
   0x2   :  { %v27_v1 = vld [vmem:[%s807_s1] sm:$0xff]  ;;  %566 = vmatprep.subr.msk.mxu0 %vm69_vm0, %v31_v0  ;;  %v35_v4 = vld [vmem:[%s808_s2 + $0x18] sm:$0xff]  ;;  %v33_v6 = vld [vmem:[%s808_s2 + $0x8] sm:$0xff] }
   0x3   :  { %568 = vmatprep.mubr.msk.f32.mxu0 %vm56_vm1, %v27_v1  ;;  %567 = vmatpush3.msk.msra.mxu0 %vm69_vm0, %v31_v0  ;;  %v30_v7 = vld [vmem:[%s807_s1 + $0x18] sm:$0xff]  ;;  %v34_v8 = vld [vmem:[%s808_s2 + $0x10] sm:$0xff]  ;;  %v32_v9 = vld [vmem:[%s808_s2] sm:$0xff] }
   0x4   :  { %569 = vmatmul.mubr.msk.f32.vlgmr.msra.gmra.mxu0 %vm56_vm1, %v28_v2  ;;  %53 = vperm.xlu0 %617, %v35_v4  }
   0x5   :  { %571 = vmatprep.mubr.msk.f32.mxu0 %vm56_vm1, %v29_v3  ;;  %43 = vperm.xlu1 %618, %v33_v6  }
   0x6   :  { %12 = vsyncpa [#allocation3], 0  ;;  %v169_v10 = vld [vmem:[%s810_s4 + $0x18] sm:$0xff]  ;;  %v168_v11 = vld [vmem:[%s810_s4 + $0x10] sm:$0xff]  ;;  %vm190_vm2 = vcmask 261120   ;;  %v666_v59 = vmov 0.0  }
   0x7   :  { %v167_v12 = vld [vmem:[%s810_s4 + $0x8] sm:$0xff]  ;;  %v166_v13 = vld [vmem:[%s810_s4] sm:$0xff]  ;;  %v534_v14 = vld [vmem:[%s810_s4 + $0x38] sm:$0xff]  ;;  %vm667_vm3 = vmmov 0   ;;  %s668_s23 = smov [#allocation2]  }
   0x8   :  { %572 = vmatmul.mubr.msk.f32.gmra.mxu0 %vm56_vm1, %v30_v7  ;;  %48 = vperm.xlu0 %617, %v34_v8   ;;  %v533_v15 = vld [vmem:[%s810_s4 + $0x30] sm:$0xff]  ;;  %v532_v16 = vld [vmem:[%s810_s4 + $0x28] sm:$0xff]  ;;  %v531_v17 = vld [vmem:[%s810_s4 + $0x20] sm:$0xff]  ;;  %s510_s24 = sshll.u32 %s668_s23, 4  ;;  %s511_s24 = int_to_ptr.vmem [resolvable:$true] %s510_s24 }
   0x9   :  { %38 = vperm.xlu1 %618, %v32_v9   ;;  %v424_v18 = vld [vmem:[%s812_s6] sm:$0xf]  ;;  %v163_v36 = vld [vmem:[%s809_s3 + $0x8] sm:$0xff]  ;;  %v164_v37 = vld [vmem:[%s809_s3 + $0x10] sm:$0xff]  ;;  %s643_s25 = scalar_lea.vmem %s511_s24, 64  ;;  %p648_p1 = scmp.lt.s32.totalorder %s511_s24, %s511_s24 }
   0xa   :  { %v162_v19 = vld [vmem:[%s809_s3] sm:$0xff]  ;;  %v165_v38 = vld [vmem:[%s809_s3 + $0x18] sm:$0xff]  ;;  %v528_v56 = vld [vmem:[%s809_s3 + $0x28] sm:$0xff]  ;;  %p644_p0 = scmp.ne.s32.totalorder %s511_s24, %s643_s25  ;;  %p649_p2 = scmp.lt.s32.totalorder %s643_s25, %s643_s25 }
   0xb   :  { %582 = vmatprep.mubr.msk.f32.mxu1 %vm190_vm2, %v162_v19  ;;  %v527_v39 = vld [vmem:[%s809_s3 + $0x20] sm:$0xff]  ;;  %v529_v57 = vld [vmem:[%s809_s3 + $0x30] sm:$0xff]  ;;  %v530_v58 = vld [vmem:[%s809_s3 + $0x38] sm:$0xff] }
   0xc   :  { %187 = vperm.xlu0 %617, %v169_v10   ;;  %596 = vmatprep.mubr.msk.f32.mxu0 %vm190_vm2, %v527_v39  ;;  %p650_p3 = por %p649_p2, %p648_p1 }
   0xd   :  { %182 = vperm.xlu1 %618, %v168_v11   ;;  %v423_v11 = vld [vmem:[%s811_s5] sm:$0xf] }
   0xe   :  { %p651_p4 = pnand %p650_p3, %p644_p0 }
  0x10   :  { %177 = vperm.xlu0 %617, %v167_v12  }
  0x11   :  { %172 = vperm.xlu1 %618, %v166_v13  }
  0x14   :  { %319 = vperm.xlu0 %617, %v534_v14  }
  0x15   :  { %314 = vperm.xlu1 %618, %v533_v15  }
  0x18   :  { %309 = vperm.xlu0 %617, %v532_v16  }
  0x19   :  { %304 = vperm.xlu1 %618, %v531_v17  }
  0x1c   :  { %427 = vperm.xlu0 %617, %v424_v18  }
  0x7f   :  { %v54_v20 = vpop.permute.xlu0 %53 }
  0x80   :  { %v44_v22 = vpop.permute.xlu1 %43 }
  0x83   :  { %v49_v26 = vpop.permute.xlu0 %48 }
  0x84   :  { %v39_v30 = vpop.permute.xlu1 %38 }
  0x87   :  { %v188_v40 = vpop.permute.xlu0 %187 }
  0x88   :  { %v183_v42 = vpop.permute.xlu1 %182 }
  0x8b   :  { %v178_v46 = vpop.permute.xlu0 %177 }
  0x8c   :  { %v173_v50 = vpop.permute.xlu1 %172 }
  0x8f   :  { %v320_v60 = vpop.permute.xlu0 %319 }
  0x90   :  { %v315_v62 = vpop.permute.xlu1 %314 }
  0x93   :  { %v310_v2 = vpop.permute.xlu0 %309 }
  0x94   :  { %v305_v6 = vpop.permute.xlu1 %304 }
  0x97   :  { %v428_v13 = vpop.permute.xlu0 %427 }
  0xc4   :  { %v570_v21 = vpop.f32.mrf.mxu0 }
  0xc5   :  { %v145_v28 = vadd.f32 %v570_v21, %v44_v22 }
  0xc6   :  { %v139_v23 = vpop.f32.mrf.mxu0 }
  0xc7   :  { %v140_v31 = vadd.f32 %v139_v23, %v39_v30 }
  0xc8   :  { %v573_v24 = vpop.f32.mrf.mxu0 }
  0xc9   :  { %v155_v25 = vadd.f32 %v573_v24, %v54_v20 }
  0xca   :  { %v149_v27 = vpop.f32.mrf.mxu0 }
  0xcb   :  { %619 = vtanh.f32 %v155_v25  ;;  %v150_v29 = vadd.f32 %v149_v27, %v49_v26 }
  0xcd   :  { %621 = vtanh.f32 %v150_v29 }
  0xce   :  { %623 = vtanh.f32 %v145_v28 }
  0xcf   :  { %625 = vtanh.f32 %v140_v31 }
  0xd8   :  { %v620_v32 = vpop.eup %619 }
  0xd9   :  { %574 = vmatprep.subr.mxu1 %v620_v32 }
  0xda   :  { %v622_v33 = vpop.eup %621  ;;  %575 = vmatpush3.msra.mxu1 %v620_v32 }
  0xdb   :  { %576 = vmatprep.subr.mxu1 %v622_v33  ;;  %v624_v34 = vpop.eup %623 }
  0xdc   :  { %577 = vmatpush3.msra.mxu1 %v622_v33  ;;  %v626_v35 = vpop.eup %625 }
  0xdd   :  { %578 = vmatprep.subr.mxu1 %v624_v34 }
  0xde   :  { %579 = vmatpush3.msra.mxu1 %v624_v34 }
  0xdf   :  { %580 = vmatprep.subr.mxu1 %v626_v35 }
  0xe0   :  { %581 = vmatpush3.msra.mxu1 %v626_v35 }
  0xe1   :  { %583 = vmatmul.mubr.msk.f32.vlgmr.msra.gmra.mxu1 %vm190_vm2, %v163_v36  ;;  %602 = vmatprep.subr.mxu1 %v666_v59 }
  0xe2   :  { %585 = vmatprep.mubr.msk.f32.mxu1 %vm190_vm2, %v164_v37 }
  0xe5   :  { %586 = vmatmul.mubr.msk.f32.gmra.mxu1 %vm190_vm2, %v165_v38 }
  0xe6   :  { %610 = vmatprep.mubr.msk.f32.mxu1 %vm667_vm3, %v666_v59 }
 0x1a1   :  { %v584_v41 = vpop.f32.mrf.mxu1 }
 0x1a2   :  { %v275_v48 = vadd.f32 %v584_v41, %v178_v46 }
 0x1a3   :  { %v269_v43 = vpop.f32.mrf.mxu1 }
 0x1a4   :  { %v270_v51 = vadd.f32 %v269_v43, %v173_v50 }
 0x1a5   :  { %v587_v44 = vpop.f32.mrf.mxu1 }
 0x1a6   :  { %v285_v45 = vadd.f32 %v587_v44, %v188_v40 }
 0x1a7   :  { %v279_v47 = vpop.f32.mrf.mxu1 }
 0x1a8   :  { %627 = vtanh.f32 %v285_v45  ;;  %v280_v49 = vadd.f32 %v279_v47, %v183_v42 }
 0x1aa   :  { %629 = vtanh.f32 %v280_v49 }
 0x1ab   :  { %631 = vtanh.f32 %v275_v48 }
 0x1ac   :  { %633 = vtanh.f32 %v270_v51 }
 0x1b5   :  { %v628_v52 = vpop.eup %627 }
 0x1b6   :  { %588 = vmatprep.subr.mxu0 %v628_v52 }
 0x1b7   :  { %v630_v53 = vpop.eup %629  ;;  %589 = vmatpush3.msra.mxu0 %v628_v52 }
 0x1b8   :  { %590 = vmatprep.subr.mxu0 %v630_v53  ;;  %v632_v54 = vpop.eup %631 }
 0x1b9   :  { %591 = vmatpush3.msra.mxu0 %v630_v53  ;;  %v634_v55 = vpop.eup %633 }
 0x1ba   :  { %592 = vmatprep.subr.mxu0 %v632_v54 }
 0x1bb   :  { %593 = vmatpush3.msra.mxu0 %v632_v54 }
 0x1bc   :  { %594 = vmatprep.subr.mxu0 %v634_v55 }
 0x1bd   :  { %595 = vmatpush3.msra.mxu0 %v634_v55 }
 0x1be   :  { %597 = vmatmul.mubr.msk.f32.vlgmr.msra.gmra.mxu0 %vm190_vm2, %v528_v56 }
 0x1bf   :  { %599 = vmatprep.mubr.msk.f32.mxu0 %vm190_vm2, %v529_v57 }
 0x1c2   :  { %600 = vmatmul.mubr.msk.f32.gmra.mxu0 %vm190_vm2, %v530_v58 }
 0x27e   :  { %v598_v61 = vpop.f32.mrf.mxu0 }
 0x27f   :  { %v406_v4 = vadd.f32 %v598_v61, %v310_v2 }
 0x280   :  { %v400_v63 = vpop.f32.mrf.mxu0 }
 0x281   :  { %v401_v7 = vadd.f32 %v400_v63, %v305_v6 }
 0x282   :  { %v601_v0 = vpop.f32.mrf.mxu0 }
 0x283   :  { %v416_v1 = vadd.f32 %v601_v0, %v320_v60 }
 0x284   :  { %v410_v3 = vpop.f32.mrf.mxu0 }
 0x285   :  { %635 = vtanh.f32 %v416_v1  ;;  %v411_v5 = vadd.f32 %v410_v3, %v315_v62 }
 0x287   :  { %637 = vtanh.f32 %v411_v5 }
 0x288   :  { %639 = vtanh.f32 %v406_v4 }
 0x289   :  { %641 = vtanh.f32 %v401_v7 }
 0x292   :  { %v636_v8 = vpop.eup %635 }
 0x293   :  { %603 = vmatpush3.msra.mxu1 %v636_v8 }
 0x294   :  { %v638_v9 = vpop.eup %637  ;;  %604 = vmatprep.subr.mxu1 %v666_v59 }
 0x295   :  { %605 = vmatpush3.msra.mxu1 %v638_v9  ;;  %v640_v10 = vpop.eup %639 }
 0x296   :  { %606 = vmatprep.subr.mxu1 %v666_v59  ;;  %v642_v12 = vpop.eup %641 }
 0x297   :  { %607 = vmatpush3.msra.mxu1 %v640_v10 }
 0x298   :  { %608 = vmatprep.subr.mxu1 %v666_v59 }
 0x299   :  { %609 = vmatpush3.msra.mxu1 %v642_v12 }
 0x29a   :  { %611 = vmatmul.mubr.msk.f32.vlgmr.msra.gmra.mxu1 %vm190_vm2, %v423_v11 }
 0x35a   :  { %v499_v14 = vpop.f32.mrf.mxu1 }
 0x35b   :  { %v500_v15 = vadd.f32 %v499_v14, %v428_v13 }
 0x35c   :  { %v612_v16 = vpop.f32.mrf.mxu1 }
 0x35d   :  { %503 = vst [vmem:[#allocation2] sm:$0xf] %v500_v15 }
 0x35e   :  { %654 = shalt.err (!%p651_p4)
}
 0x35f   :  { %513 = dma.vmem_to_hbm [thread:$0]  %s511_s24, 64, %s813_s7, [#allocation3]  }
 0x360   :  { %663 = dma.done.wait [#allocation3], 64  }
 0x361   :  { %664 = vsyncadd [#allocation3], 4294967232 }
 0x362   :  { %517 = vsyncpa [#allocation3], 1 }

</bundles_post_ra>
